<compile_context>
chip_gen: v7x
topology: tpu7x:2x2x1
jax: 0.10.0
libtpu: 0.0.40
codegen_flags: <defaults>
</compile_context>

<pallas_src>
import functools

import jax
import jax.numpy as jnp
from jax.experimental import pallas as pl
from jax.experimental.pallas import tpu as pltpu


# ----------------------------------------------------------------------------
# parameter construction (mirrors ValueFn.__init__ with dotp=True)
# ----------------------------------------------------------------------------
def _orthogonal(key, shape):
    """Deterministic orthogonal init (same role as nn.init.orthogonal_)."""
    return jax.nn.initializers.orthogonal()(key, shape, jnp.float32)


def init_valuefn_params(layer_sizes, key):
    assert layer_sizes[-1] == 1, "value_fn last layer size must be 1"
    n_layers = len(layer_sizes) - 1
    ws, bs = [], []
    s_ws, s_bs, g_ws, g_bs = [], [], [], []
    keys = jax.random.split(key, 4 * n_layers)
    kidx = 0
    for i in range(n_layers):
        dim0 = layer_sizes[i]
        dim1 = layer_sizes[i + 1]
        if i == 0:
            dim0 = layer_sizes[0] + layer_sizes[-2]
        ws.append(_orthogonal(keys[kidx], (dim0, dim1))); kidx += 1
        bs.append(jnp.zeros((1, dim1), jnp.float32))
        if i == 0:
            dim0 = layer_sizes[0] // 2
        else:
            dim0 = layer_sizes[i]
        if i == n_layers - 1:
            break
        s_ws.append(_orthogonal(keys[kidx], (dim0, dim1))); kidx += 1
        g_ws.append(_orthogonal(keys[kidx], (dim0, dim1))); kidx += 1
        s_bs.append(jnp.zeros((1, dim1), jnp.float32))
        g_bs.append(jnp.zeros((1, dim1), jnp.float32))
    return dict(weights=ws, biases=bs,
                s_weights=s_ws, s_biases=s_bs,
                g_weights=g_ws, g_biases=g_bs)


# ----------------------------------------------------------------------------
# kernel
# ----------------------------------------------------------------------------
def _valuefn_kernel(n_side, n_mid, mm_dtype, bias_segs, *refs):
    """Feature-major ValueFn forward for one batch tile.

    ref order:
      state_t (half, TB|1), goal_t (half, TB|1),
      bd_w[0..n_side)   block-diag side weights, transposed: (2*out_i, 2*in_i),
      w0_T (L1, 2*half + L_pen),
      w_mid_T[0..n_mid),
      w_last (H, 1),
      bias_slab (total_rows, 1)   -- all biases, feature-major, 8-row aligned,
      out (1, TB)

    bias_segs: static ((offset, rows), ...) into bias_slab, consumed in the
    order: side-branch biases, b0, mid biases, b_last.
    """
    out_ref = refs[-1]
    it = iter(refs[:-1])
    state_ref = next(it)
    goal_ref = next(it)
    bd_w = [next(it) for _ in range(n_side)]
    w0T = next(it)
    w_mid = [next(it) for _ in range(n_mid)]
    w_last = next(it)
    b_slab = next(it)

    seg = iter(bias_segs)

    def bias():
        off, rows = next(seg)
        return b_slab[off:off + rows, :]           # static slice -> (rows, 1) f32

    def mm(w_ref, x):
        # MXU matmul: operands already in mm_dtype, accumulation stays f32.
        return jnp.dot(w_ref[...], x, preferred_element_type=jnp.float32)

    tb = out_ref.shape[-1]
    state = state_ref[...]                         # (half, TB) or (half, 1)
    goal = goal_ref[...]
    if state.shape[1] != tb:                       # batch-1 broadcast (in VMEM)
        state = jnp.broadcast_to(state, (state.shape[0], tb))
    if goal.shape[1] != tb:
        goal = jnp.broadcast_to(goal, (goal.shape[0], tb))

    # sublane-stacked [state; goal] in matmul dtype (16+16 rows, aligned)
    sg_in = jnp.concatenate([state, goal], axis=0)

    # fused dot-product side branches: one block-diag matmul per layer
    act = sg_in
    for i in range(n_side):
        act = mm(bd_w[i], act) + bias()            # f32 (2*out_i, TB)
        if i + 1 < n_side:
            act = act.astype(mm_dtype)
    l_pen = act.shape[0] // 2
    sg = act[:l_pen, :] * act[l_pen:, :]           # f32 (L_pen, TB), elementwise

    # first main layer: ONE matmul over sublane-stacked [state; goal; s*g]
    x_in = jnp.concatenate([sg_in, sg.astype(mm_dtype)], axis=0)
    x = jnp.maximum(mm(w0T, x_in) + bias(), 0.0)

    # middle main layers with ReLU
    for i in range(n_mid):
        x = jnp.maximum(mm(w_mid[i], x.astype(mm_dtype)) + bias(), 0.0)

    # last (H -> 1) layer as VPU multiply + sublane (XLU) reduce -> lane-dense row
    v = jnp.sum(x * w_last[...], axis=0, keepdims=True) + bias()
    out_ref[...] = jnp.minimum(v, 0.0)             # min(0, x[:, 0])


# ----------------------------------------------------------------------------
# wrapper
# ----------------------------------------------------------------------------
def _round_up(x, m):
    return ((x + m - 1) // m) * m


def valuefn_forward(state, goal, params, *,
                    matmul_dtype=jnp.bfloat16, batch_tile=2048):
    """Pallas-backed equivalent of ValueFn.forward (dotp=True). Returns shape [B].

    Accuracy contract: with the default matmul_dtype=bfloat16, weights are
    quantised once and activations once per matmul (f32 accumulation);
    pass matmul_dtype=jnp.float32 for bit-accurate-to-reference results.
    """
    assert batch_tile % 128 == 0
    state = jnp.asarray(state, jnp.float32)
    goal = jnp.asarray(goal, jnp.float32)
    sB, half = state.shape
    gB, ghalf = goal.shape
    assert ghalf == half

    # effective batch (same semantics as the torch .repeat logic)
    if sB == 1 and gB > 1:
        B = gB
    elif gB == 1 and sB > 1:
        B = sB
    else:
        assert sB == gB, "incompatible batch sizes"
        B = sB

    ws, bs = params["weights"], params["biases"]
    s_ws, s_bs = params["s_weights"], params["s_biases"]
    g_ws, g_bs = params["g_weights"], params["g_biases"]
    n_main = len(ws)
    n_side = len(s_ws)
    assert n_main >= 2 and n_side == n_main - 1
    mmdt = matmul_dtype

    # ---- layout plumbing (tiny, plain XLA): feature-major parameters ----
    # Block-diagonal fused side weights (s and g share dims per layer).
    bd_ws, bias_cols = [], []
    for sw, gw, sb, gb in zip(s_ws, g_ws, s_bs, g_bs):
        swT = jnp.asarray(sw, jnp.float32).T       # (out, in)
        gwT = jnp.asarray(gw, jnp.float32).T
        z = jnp.zeros_like(swT)
        bd = jnp.concatenate([jnp.concatenate([swT, z], axis=1),
                              jnp.concatenate([z, gwT], axis=1)], axis=0)
        bd_ws.append(bd.astype(mmdt))              # (2*out, 2*in)
        bias_cols.append(jnp.concatenate([jnp.asarray(sb, jnp.float32).T,
                                          jnp.asarray(gb, jnp.float32).T], axis=0))

    # First main layer: w[0].T applied to stacked [state; goal; s*g] -> 1 matmul.
    w0T = jnp.asarray(ws[0], mmdt).T               # (L1, 2*half + L_pen)
    bias_cols.append(jnp.asarray(bs[0], jnp.float32).T)
    wMT = []
    for i in range(1, n_main - 1):
        wMT.append(jnp.asarray(ws[i], mmdt).T)
        bias_cols.append(jnp.asarray(bs[i], jnp.float32).T)
    w_last = jnp.asarray(ws[-1], jnp.float32)      # (H, 1), VPU operand -> keep f32
    bias_cols.append(jnp.asarray(bs[-1], jnp.float32).T)   # (1, 1)

    # Pack all bias columns into one 8-row-aligned slab (one resident ref/DMA).
    bias_segs, pieces, off = [], [], 0
    for c in bias_cols:
        rows = c.shape[0]
        pad = (-rows) % 8
        bias_segs.append((off, rows))
        pieces.append(jnp.pad(c, ((0, pad), (0, 0))))
        off += rows + pad
    bias_slab = jnp.concatenate(pieces, axis=0)    # (total_rows, 1) f32

    # Feature-major, matmul-dtype inputs (transpose + cast fused by XLA).
    state_t = state.T.astype(mmdt)                 # (half, sB)
    goal_t = goal.T.astype(mmdt)                   # (half, gB)

    # Batch tile: >= 2 grid steps when B > 128 (keeps both v7x TCs busy),
    # capped by batch_tile, always a multiple of 128 (BlockSpec constraint).
    if B <= 128:
        TB = B
    else:
        TB = min(batch_tile, _round_up(pl.cdiv(B, 2), 128))
    grid = (pl.cdiv(B, TB),)

    def resident(arr):                             # weights/biases: same block every step
        return pl.BlockSpec(arr.shape, lambda i: (0, 0))

    def batched(arr, nbatch):
        if nbatch == 1:                            # broadcast operand stays resident
            return pl.BlockSpec((arr.shape[0], 1), lambda i: (0, 0))
        return pl.BlockSpec((arr.shape[0], TB), lambda i: (0, i))

    inputs = ([state_t, goal_t] + bd_ws + [w0T] + wMT + [w_last, bias_slab])
    in_specs = ([batched(state_t, sB), batched(goal_t, gB)]
                + [resident(a) for a in inputs[2:]])

    # Advisory cost estimate so XLA overlaps this small custom call properly.
    flops_per_sample = 2 * w_last.shape[0]
    for w in bd_ws + [w0T] + wMT:
        flops_per_sample += 2 * int(w.shape[0]) * int(w.shape[1])
    weight_bytes = sum(int(a.size) * a.dtype.itemsize for a in inputs[2:])
    bytes_accessed = (int(state_t.size) * state_t.dtype.itemsize
                      + int(goal_t.size) * goal_t.dtype.itemsize
                      + B * 4 + weight_bytes)
    cost = pl.CostEstimate(flops=int(flops_per_sample) * int(B),
                           transcendentals=0,
                           bytes_accessed=int(bytes_accessed))

    out = pl.pallas_call(
        functools.partial(_valuefn_kernel, n_side, n_main - 2, mmdt,
                          tuple(bias_segs)),
        out_shape=jax.ShapeDtypeStruct((1, B), jnp.float32),
        grid=grid,
        in_specs=in_specs,
        out_specs=pl.BlockSpec((1, TB), lambda i: (0, i)),
        compiler_params=pltpu.CompilerParams(
            dimension_semantics=("parallel",),
            vmem_limit_bytes=32 * 1024 * 1024),
        cost_estimate=cost,
    )(*inputs)
    return out[0]


# ----------------------------------------------------------------------------
# plain-JAX reference for correctness checking
# ----------------------------------------------------------------------------
def valuefn_forward_ref(state, goal, params):
    state = jnp.asarray(state, jnp.float32)
    goal = jnp.asarray(goal, jnp.float32)
    if state.shape[0] == 1:
        state = jnp.tile(state, (goal.shape[0], 1))
    if goal.shape[0] == 1:
        goal = jnp.tile(goal, (state.shape[0], 1))
    s, g = state, goal
    for sw, sb, gw, gb in zip(params["s_weights"], params["s_biases"],
                              params["g_weights"], params["g_biases"]):
        s = s @ sw + sb
        g = g @ gw + gb
    x = jnp.concatenate([state, goal, s * g], axis=1)
    n = len(params["weights"])
    for i, (w, b) in enumerate(zip(params["weights"], params["biases"])):
        x = x @ w + b
        if i < n - 1:
            x = jnp.maximum(x, 0.0)
    return jnp.minimum(jnp.zeros_like(x[:, 0]), x[:, 0])


if __name__ == "__main__":
    key = jax.random.PRNGKey(0)
    k_params, k_state, k_goal, k_state2, k_goal2 = jax.random.split(key, 5)

    # layer_sizes[0] is the concatenated (state, goal) width; each is half.
    layer_sizes = [32, 64, 32, 1]
    half = layer_sizes[0] // 2  # 16

    params = init_valuefn_params(layer_sizes, k_params)

    def check(state_in, goal_in, name):
        ref = valuefn_forward_ref(state_in, goal_in, params)
        # f32 matmuls: bit-accurate-to-reference check
        out32 = jax.block_until_ready(
            valuefn_forward(state_in, goal_in, params, matmul_dtype=jnp.float32))
        assert out32.shape == ref.shape, (name, out32.shape, ref.shape)
        assert jnp.allclose(out32, ref, atol=1e-4, rtol=1e-4), (name, out32, ref)
        # default (bf16 MXU operands, f32 accumulation): looser tolerance
        outbf = jax.block_until_ready(valuefn_forward(state_in, goal_in, params))
        assert outbf.shape == ref.shape, (name, outbf.shape, ref.shape)
        assert jnp.allclose(outbf, ref, atol=5e-2, rtol=5e-2), (name, outbf, ref)

    # 1) small batch
    batch = 8
    state = jax.random.normal(k_state, (batch, half), jnp.float32)
    goal = jax.random.normal(k_goal, (batch, half), jnp.float32)
    check(state, goal, "small")

    # 2) batch-1 broadcast of `state` (handled in-kernel, no jnp.tile)
    check(state[:1], goal, "broadcast_state")

    # 3) larger batch -> 2-step 'parallel' grid, resident weights, ragged tail
    big = 1000
    state_l = jax.random.normal(k_state2, (big, half), jnp.float32)
    goal_l = jax.random.normal(k_goal2, (big, half), jnp.float32)
    check(state_l, goal_l, "large")

    print("KERNEL_OK")
</pallas_src>

<mosaic_0001>
module attributes {stable_mosaic.version = 11 : i64} {
  func.func @_valuefn_kernel(%arg0: i32, %arg1: memref<16x8xf32, #tpu.memory_space<vmem>>, %arg2: memref<16x8xf32, #tpu.memory_space<vmem>>, %arg3: memref<128x32xf32, #tpu.memory_space<vmem>>, %arg4: memref<64x128xf32, #tpu.memory_space<vmem>>, %arg5: memref<64x64xf32, #tpu.memory_space<vmem>>, %arg6: memref<32x64xf32, #tpu.memory_space<vmem>>, %arg7: memref<32x1xf32, #tpu.memory_space<vmem>>, %arg8: memref<296x1xf32, #tpu.memory_space<vmem>>, %arg9: memref<1x8xf32, #tpu.memory_space<vmem>>) attributes {dimension_semantics = [#tpu.dimension_semantics<parallel>], iteration_bounds = array<i64: 1>, scalar_prefetch = 0 : i64, scratch_operands = 0 : i64, tpu.core_type = #tpu.core_type<tc>, window_params = [{transform_indices = @transform_0, window_bounds = array<i64: 16, 8>}, {transform_indices = @transform_1, window_bounds = array<i64: 16, 8>}, {pipeline_mode = #tpu.pipeline_mode<synchronous>, transform_indices = @transform_2, window_bounds = array<i64: 128, 32>}, {pipeline_mode = #tpu.pipeline_mode<synchronous>, transform_indices = @transform_3, window_bounds = array<i64: 64, 128>}, {pipeline_mode = #tpu.pipeline_mode<synchronous>, transform_indices = @transform_4, window_bounds = array<i64: 64, 64>}, {pipeline_mode = #tpu.pipeline_mode<synchronous>, transform_indices = @transform_5, window_bounds = array<i64: 32, 64>}, {pipeline_mode = #tpu.pipeline_mode<synchronous>, transform_indices = @transform_6, window_bounds = array<i64: 32, 1>}, {pipeline_mode = #tpu.pipeline_mode<synchronous>, transform_indices = @transform_7, window_bounds = array<i64: 296, 1>}, {transform_indices = @transform_8, window_bounds = array<i64: 1, 8>}]} {
    %c0 = arith.constant 0 : index
    %c0_0 = arith.constant 0 : index
    %0 = vector.load %arg1[%c0, %c0_0] : memref<16x8xf32, #tpu.memory_space<vmem>>, vector<16x8xf32>
    %c0_1 = arith.constant 0 : index
    %c0_2 = arith.constant 0 : index
    %1 = vector.load %arg2[%c0_1, %c0_2] : memref<16x8xf32, #tpu.memory_space<vmem>>, vector<16x8xf32>
    %2 = tpu.concatenate %0, %1 in 0 : vector<16x8xf32>, vector<16x8xf32> -> vector<32x8xf32>
    %c0_3 = arith.constant 0 : index
    %c0_4 = arith.constant 0 : index
    %3 = vector.load %arg3[%c0_3, %c0_4] : memref<128x32xf32, #tpu.memory_space<vmem>>, vector<128x32xf32>
    %cst = arith.constant dense<0.000000e+00> : vector<128x8xf32>
    %4 = tpu.matmul %3, %2, %cst {dimension_numbers = #tpu.dot_dimension_numbers<[1], [0], [0], [1], [0, 0, 1, 1], [], []>} : vector<128x32xf32>, vector<32x8xf32>, vector<128x8xf32> -> vector<128x8xf32>
    %c0_5 = arith.constant 0 : index
    %c0_6 = arith.constant 0 : index
    %5 = vector.load %arg8[%c0_5, %c0_6] : memref<296x1xf32, #tpu.memory_space<vmem>>, vector<128x1xf32>
    %6 = vector.broadcast %5 : vector<128x1xf32> to vector<128x8xf32>
    %7 = arith.addf %4, %6 : vector<128x8xf32>
    %c0_7 = arith.constant 0 : index
    %c0_8 = arith.constant 0 : index
    %8 = vector.load %arg4[%c0_7, %c0_8] : memref<64x128xf32, #tpu.memory_space<vmem>>, vector<64x128xf32>
    %cst_9 = arith.constant dense<0.000000e+00> : vector<64x8xf32>
    %9 = tpu.matmul %8, %7, %cst_9 {dimension_numbers = #tpu.dot_dimension_numbers<[1], [0], [0], [1], [0, 0, 1, 1], [], []>} : vector<64x128xf32>, vector<128x8xf32>, vector<64x8xf32> -> vector<64x8xf32>
    %c128 = arith.constant 128 : index
    %c0_10 = arith.constant 0 : index
    %10 = vector.load %arg8[%c128, %c0_10] : memref<296x1xf32, #tpu.memory_space<vmem>>, vector<64x1xf32>
    %11 = vector.broadcast %10 : vector<64x1xf32> to vector<64x8xf32>
    %12 = arith.addf %9, %11 : vector<64x8xf32>
    %13 = vector.extract_strided_slice %12 {offsets = [0, 0], sizes = [32, 8], strides = [1, 1]} : vector<64x8xf32> to vector<32x8xf32>
    %14 = vector.extract_strided_slice %12 {offsets = [32, 0], sizes = [32, 8], strides = [1, 1]} : vector<64x8xf32> to vector<32x8xf32>
    %15 = arith.mulf %13, %14 : vector<32x8xf32>
    %16 = tpu.concatenate %2, %15 in 0 : vector<32x8xf32>, vector<32x8xf32> -> vector<64x8xf32>
    %c0_11 = arith.constant 0 : index
    %c0_12 = arith.constant 0 : index
    %17 = vector.load %arg5[%c0_11, %c0_12] : memref<64x64xf32, #tpu.memory_space<vmem>>, vector<64x64xf32>
    %cst_13 = arith.constant dense<0.000000e+00> : vector<64x8xf32>
    %18 = tpu.matmul %17, %16, %cst_13 {dimension_numbers = #tpu.dot_dimension_numbers<[1], [0], [0], [1], [0, 0, 1, 1], [], []>} : vector<64x64xf32>, vector<64x8xf32>, vector<64x8xf32> -> vector<64x8xf32>
    %c192 = arith.constant 192 : index
    %c0_14 = arith.constant 0 : index
    %19 = vector.load %arg8[%c192, %c0_14] : memref<296x1xf32, #tpu.memory_space<vmem>>, vector<64x1xf32>
    %20 = vector.broadcast %19 : vector<64x1xf32> to vector<64x8xf32>
    %21 = arith.addf %18, %20 : vector<64x8xf32>
    %cst_15 = arith.constant 0.000000e+00 : f32
    %22 = vector.broadcast %cst_15 : f32 to vector<64x8xf32>
    %23 = arith.maximumf %21, %22 : vector<64x8xf32>
    %c0_16 = arith.constant 0 : index
    %c0_17 = arith.constant 0 : index
    %24 = vector.load %arg6[%c0_16, %c0_17] : memref<32x64xf32, #tpu.memory_space<vmem>>, vector<32x64xf32>
    %cst_18 = arith.constant dense<0.000000e+00> : vector<32x8xf32>
    %25 = tpu.matmul %24, %23, %cst_18 {dimension_numbers = #tpu.dot_dimension_numbers<[1], [0], [0], [1], [0, 0, 1, 1], [], []>} : vector<32x64xf32>, vector<64x8xf32>, vector<32x8xf32> -> vector<32x8xf32>
    %c256 = arith.constant 256 : index
    %c0_19 = arith.constant 0 : index
    %26 = vector.load %arg8[%c256, %c0_19] : memref<296x1xf32, #tpu.memory_space<vmem>>, vector<32x1xf32>
    %27 = vector.broadcast %26 : vector<32x1xf32> to vector<32x8xf32>
    %28 = arith.addf %25, %27 : vector<32x8xf32>
    %cst_20 = arith.constant 0.000000e+00 : f32
    %29 = vector.broadcast %cst_20 : f32 to vector<32x8xf32>
    %30 = arith.maximumf %28, %29 : vector<32x8xf32>
    %c0_21 = arith.constant 0 : index
    %c0_22 = arith.constant 0 : index
    %31 = vector.load %arg7[%c0_21, %c0_22] : memref<32x1xf32, #tpu.memory_space<vmem>>, vector<32x1xf32>
    %32 = vector.broadcast %31 : vector<32x1xf32> to vector<32x8xf32>
    %33 = arith.mulf %30, %32 : vector<32x8xf32>
    %cst_23 = arith.constant dense<0.000000e+00> : vector<8xf32>
    %34 = vector.multi_reduction <add>, %33, %cst_23 [0] : vector<32x8xf32> to vector<8xf32>
    %35 = vector.shape_cast %34 : vector<8xf32> to vector<1x8xf32>
    %c288 = arith.constant 288 : index
    %c0_24 = arith.constant 0 : index
    %36 = vector.load %arg8[%c288, %c0_24] : memref<296x1xf32, #tpu.memory_space<vmem>>, vector<1x1xf32>
    %37 = vector.broadcast %36 : vector<1x1xf32> to vector<1x8xf32>
    %38 = arith.addf %35, %37 : vector<1x8xf32>
    %cst_25 = arith.constant 0.000000e+00 : f32
    %39 = vector.broadcast %cst_25 : f32 to vector<1x8xf32>
    %40 = arith.minimumf %38, %39 : vector<1x8xf32>
    %c0_26 = arith.constant 0 : index
    %c0_27 = arith.constant 0 : index
    %41 = vector.load %arg9[%c0_26, %c0_27] : memref<1x8xf32, #tpu.memory_space<vmem>>, vector<1x8xf32>
    tpu.vector_store %arg9[%c0_26, %c0_27], %40 {strides = array<i32>} : memref<1x8xf32, #tpu.memory_space<vmem>>, vector<1x8xf32>,
    return
  }
  func.func @transform_0(%arg0: i32) -> (i32, i32) {
    %c0_i32 = arith.constant 0 : i32
    %c0_i32_0 = arith.constant 0 : i32
    return %c0_i32, %arg0 : i32, i32
  }
  func.func @transform_1(%arg0: i32) -> (i32, i32) {
    %c0_i32 = arith.constant 0 : i32
    %c0_i32_0 = arith.constant 0 : i32
    return %c0_i32, %arg0 : i32, i32
  }
  func.func @transform_2(%arg0: i32) -> (i32, i32) {
    %c0_i32 = arith.constant 0 : i32
    %c0_i32_0 = arith.constant 0 : i32
    %c0_i32_1 = arith.constant 0 : i32
    return %c0_i32, %c0_i32_0 : i32, i32
  }
  func.func @transform_3(%arg0: i32) -> (i32, i32) {
    %c0_i32 = arith.constant 0 : i32
    %c0_i32_0 = arith.constant 0 : i32
    %c0_i32_1 = arith.constant 0 : i32
    return %c0_i32, %c0_i32_0 : i32, i32
  }
  func.func @transform_4(%arg0: i32) -> (i32, i32) {
    %c0_i32 = arith.constant 0 : i32
    %c0_i32_0 = arith.constant 0 : i32
    %c0_i32_1 = arith.constant 0 : i32
    return %c0_i32, %c0_i32_0 : i32, i32
  }
  func.func @transform_5(%arg0: i32) -> (i32, i32) {
    %c0_i32 = arith.constant 0 : i32
    %c0_i32_0 = arith.constant 0 : i32
    %c0_i32_1 = arith.constant 0 : i32
    return %c0_i32, %c0_i32_0 : i32, i32
  }
  func.func @transform_6(%arg0: i32) -> (i32, i32) {
    %c0_i32 = arith.constant 0 : i32
    %c0_i32_0 = arith.constant 0 : i32
    %c0_i32_1 = arith.constant 0 : i32
    return %c0_i32, %c0_i32_0 : i32, i32
  }
  func.func @transform_7(%arg0: i32) -> (i32, i32) {
    %c0_i32 = arith.constant 0 : i32
    %c0_i32_0 = arith.constant 0 : i32
    %c0_i32_1 = arith.constant 0 : i32
    return %c0_i32, %c0_i32_0 : i32, i32
  }
  func.func @transform_8(%arg0: i32) -> (i32, i32) {
    %c0_i32 = arith.constant 0 : i32
    %c0_i32_0 = arith.constant 0 : i32
    return %c0_i32, %arg0 : i32, i32
  }
}

</mosaic_0001>

<bundles_post_ra>
// kernel: tpu_custom_call.1
= control target key start
LH: loop header
LB: loop body
LE: loop exit
PB: predicated region body
PF: predicated region fallthrough
CT: control target
= control target key end

     0   :  { %vm146_vm0 = vcmask 261120   ;;  %v1220_v6 = vmov 0   ;;  %s1554_s0 = inlined_call_operand.vmem [shape: f32[16,8], index: 0, kind: input, shape index: {}]   ;;  %s1555_s1 = inlined_call_operand.vmem [shape: f32[16,8], index: 1, kind: input, shape index: {}]   ;;  %s1556_s2 = inlined_call_operand.vmem [shape: f32[128,32], index: 2, kind: input, shape index: {}]   ;;  %s1557_s3 = inlined_call_operand.vmem [shape: f32[64,128], index: 3, kind: input, shape index: {}]   ;;  %s1558_s4 = inlined_call_operand.vmem [shape: f32[64,64], index: 4, kind: input, shape index: {}]   ;;  %s1559_s5 = inlined_call_operand.vmem [shape: f32[32,64], index: 5, kind: input, shape index: {}]   ;;  %s1560_s6 = inlined_call_operand.vmem [shape: f32[32,1], index: 6, kind: input, shape index: {}]   ;;  %s1561_s7 = inlined_call_operand.vmem [shape: f32[296,1], index: 7, kind: input, shape index: {}]   ;;  %s1562_s8 = inlined_call_operand.hbm [shape: f32[1,8], index: 8, kind: output, shape index: {}]  }
   0x1   :  { %v30_v0 = vld [vmem:[%s1554_s0] sm:$0xff]  ;;  %v31_v1 = vld [vmem:[%s1554_s0 + $0x8] sm:$0xff]  ;;  %1194 = vset.pattern.permute.xlu0 %v1220_v6  ;;  %1195 = vset.pattern.permute.xlu1 %v1220_v6  ;;  %v52_v10 = vld [vmem:[%s1561_s7 + $0x10] sm:$0xff] }
   0x2   :  { %v32_v2 = vld [vmem:[%s1555_s1] sm:$0xff]  ;;  %v1120_v3 = vpack.c.bf16 %v31_v1, %v30_v0  ;;  %v33_v4 = vld [vmem:[%s1555_s1 + $0x8] sm:$0xff]  ;;  %78 = vperm.xlu1 %1195, %v52_v10   ;;  %v53_v11 = vld [vmem:[%s1561_s7 + $0x18] sm:$0xff] }
   0x3   :  { %v34_v5 = vld [vmem:[%s1556_s2] sm:$0xff]  ;;  %v1124_v7 = vpack.c.bf16 %v33_v4, %v32_v2  ;;  %v51_v9 = vld [vmem:[%s1561_s7 + $0x8] sm:$0xff]  ;;  %v36_v14 = vld [vmem:[%s1556_s2 + $0x10] sm:$0xff] }
   0x4   :  { %1002 = vmatprep.mubr.msk.f32.mxu0 %vm146_vm0, %v34_v5  ;;  %v50_v8 = vld [vmem:[%s1561_s7] sm:$0xff]  ;;  %1121 = vmatprep.subr.bf16.mxu0 %v1120_v3  ;;  %v35_v12 = vld [vmem:[%s1556_s2 + $0x8] sm:$0xff]  ;;  %v37_v16 = vld [vmem:[%s1556_s2 + $0x18] sm:$0xff] }
   0x5   :  { %68 = vperm.xlu0 %1194, %v50_v8   ;;  %1123 = vmatpush3.bf16.msra.mxu0 %v1120_v3  ;;  %v54_v13 = vld [vmem:[%s1561_s7 + $0x20] sm:$0xff]  ;;  %v55_v15 = vld [vmem:[%s1561_s7 + $0x28] sm:$0xff]  ;;  %v56_v17 = vld [vmem:[%s1561_s7 + $0x30] sm:$0xff] }
   0x6   :  { %1125 = vmatprep.subr.bf16.mxu0 %v1124_v7  ;;  %83 = vperm.xlu1 %1195, %v53_v11   ;;  %v38_v18 = vld [vmem:[%s1556_s2 + $0x20] sm:$0xff]  ;;  %v57_v19 = vld [vmem:[%s1561_s7 + $0x38] sm:$0xff]  ;;  %v39_v20 = vld [vmem:[%s1556_s2 + $0x28] sm:$0xff] }
   0x7   :  { %v58_v21 = vld [vmem:[%s1561_s7 + $0x40] sm:$0xff]  ;;  %v40_v22 = vld [vmem:[%s1556_s2 + $0x30] sm:$0xff]  ;;  %v59_v23 = vld [vmem:[%s1561_s7 + $0x48] sm:$0xff] }
   0x8   :  { %v41_v24 = vld [vmem:[%s1556_s2 + $0x38] sm:$0xff]  ;;  %v60_v25 = vld [vmem:[%s1561_s7 + $0x50] sm:$0xff] }
   0x9   :  { %73 = vperm.xlu0 %1194, %v51_v9   ;;  %1127 = vmatpush3.bf16.msra.mxu0 %v1124_v7 }
   0xa   :  { %1161 = vmatprep.subr.bf16.mxu0 %v1120_v3  ;;  %93 = vperm.xlu1 %1195, %v55_v15  }
   0xc   :  { %1003 = vmatmul.mubr.msk.f32.vlgmr.msra.gmra.mrb[0].mxu0 %vm146_vm0, %v35_v12 }
   0xd   :  { %88 = vperm.xlu0 %1194, %v54_v13   ;;  %1005 = vmatprep.mubr.msk.f32.mxu0 %vm146_vm0, %v36_v14 }
   0xe   :  { %1163 = vmatpush3.bf16.msra.mxu0 %v1120_v3  ;;  %103 = vperm.xlu1 %1195, %v57_v19  }
   0xf   :  { %1165 = vmatprep.subr.bf16.mxu0 %v1124_v7 }
  0x10   :  { %1006 = vmatmul.mubr.msk.f32.gmra.mrb[2].mxu0 %vm146_vm0, %v37_v16 }
  0x11   :  { %98 = vperm.xlu0 %1194, %v56_v17   ;;  %1008 = vmatprep.mubr.msk.f32.mxu0 %vm146_vm0, %v38_v18 }
  0x12   :  { %1167 = vmatpush3.bf16.msra.mxu0 %v1124_v7 }
  0x14   :  { %1009 = vmatmul.mubr.msk.f32.gmra.mrb[4].mxu0 %vm146_vm0, %v39_v20 }
  0x15   :  { %108 = vperm.xlu0 %1194, %v58_v21   ;;  %1011 = vmatprep.mubr.msk.f32.mxu0 %vm146_vm0, %v40_v22 }
  0x16   :  { %13 = vsyncpa [#allocation3], 0  ;;  %v42_v26 = vld [vmem:[%s1556_s2 + $0x40] sm:$0xff]  ;;  %113 = vperm.xlu1 %1195, %v59_v23   ;;  %v61_v27 = vld [vmem:[%s1561_s7 + $0x58] sm:$0xff]  ;;  %vm561_vm1 = vcmask 523264   ;;  %vm856_vm2 = vcmask 64512  }
  0x17   :  { %v43_v28 = vld [vmem:[%s1556_s2 + $0x48] sm:$0xff]  ;;  %v62_v29 = vld [vmem:[%s1561_s7 + $0x60] sm:$0xff]  ;;  %v44_v30 = vld [vmem:[%s1556_s2 + $0x50] sm:$0xff]  ;;  %vm878_vm3 = vcmask 57344  }
  0x18   :  { %1012 = vmatmul.mubr.msk.f32.gmra.mrb[6].mxu0 %vm146_vm0, %v41_v24  ;;  %v63_v31 = vld [vmem:[%s1561_s7 + $0x68] sm:$0xff]  ;;  %v45_v32 = vld [vmem:[%s1556_s2 + $0x58] sm:$0xff]  ;;  %v64_v33 = vld [vmem:[%s1561_s7 + $0x70] sm:$0xff] }
  0x19   :  { %118 = vperm.xlu0 %1194, %v60_v25   ;;  %1014 = vmatprep.mubr.msk.f32.mxu0 %vm146_vm0, %v42_v26  ;;  %v46_v34 = vld [vmem:[%s1556_s2 + $0x60] sm:$0xff]  ;;  %v65_v35 = vld [vmem:[%s1561_s7 + $0x78] sm:$0xff]  ;;  %v47_v36 = vld [vmem:[%s1556_s2 + $0x68] sm:$0xff] }
  0x1a   :  { %123 = vperm.xlu1 %1195, %v61_v27   ;;  %v348_v37 = vld [vmem:[%s1561_s7 + $0x80] sm:$0xff]  ;;  %v48_v38 = vld [vmem:[%s1556_s2 + $0x70] sm:$0xff]  ;;  %v349_v39 = vld [vmem:[%s1561_s7 + $0x88] sm:$0xff] }
  0x1b   :  { %v49_v40 = vld [vmem:[%s1556_s2 + $0x78] sm:$0xff]  ;;  %v352_v41 = vld [vmem:[%s1561_s7 + $0xa0] sm:$0xff]  ;;  %v353_v42 = vld [vmem:[%s1561_s7 + $0xa8] sm:$0xff] }
  0x1c   :  { %1015 = vmatmul.mubr.msk.f32.gmra.mrb[8].mxu0 %vm146_vm0, %v43_v28  ;;  %v350_v43 = vld [vmem:[%s1561_s7 + $0x90] sm:$0xff]  ;;  %v351_v44 = vld [vmem:[%s1561_s7 + $0x98] sm:$0xff]  ;;  %v513_v47 = vld [vmem:[%s1561_s7 + $0xc0] sm:$0xff] }
  0x1d   :  { %128 = vperm.xlu0 %1194, %v62_v29   ;;  %1017 = vmatprep.mubr.msk.f32.mxu0 %vm146_vm0, %v44_v30  ;;  %v354_v45 = vld [vmem:[%s1561_s7 + $0xb0] sm:$0xff]  ;;  %v355_v46 = vld [vmem:[%s1561_s7 + $0xb8] sm:$0xff]  ;;  %v514_v48 = vld [vmem:[%s1561_s7 + $0xc8] sm:$0xff] }
  0x1e   :  { %133 = vperm.xlu1 %1195, %v63_v31   ;;  %v515_v49 = vld [vmem:[%s1561_s7 + $0xd0] sm:$0xff]  ;;  %v516_v50 = vld [vmem:[%s1561_s7 + $0xd8] sm:$0xff]  ;;  %v517_v51 = vld [vmem:[%s1561_s7 + $0xe0] sm:$0xff] }
  0x1f   :  { %v518_v52 = vld [vmem:[%s1561_s7 + $0xe8] sm:$0xff]  ;;  %v519_v53 = vld [vmem:[%s1561_s7 + $0xf0] sm:$0xff]  ;;  %v520_v54 = vld [vmem:[%s1561_s7 + $0xf8] sm:$0xff] }
  0x20   :  { %1018 = vmatmul.mubr.msk.f32.gmra.mrb[10].mxu0 %vm146_vm0, %v45_v32  ;;  %v703_v55 = vld [vmem:[%s1561_s7 + $0x100] sm:$0xff]  ;;  %v704_v56 = vld [vmem:[%s1561_s7 + $0x108] sm:$0xff]  ;;  %v705_v57 = vld [vmem:[%s1561_s7 + $0x110] sm:$0xff] }
  0x21   :  { %138 = vperm.xlu0 %1194, %v64_v33   ;;  %1020 = vmatprep.mubr.msk.f32.mxu0 %vm146_vm0, %v46_v34  ;;  %v706_v58 = vld [vmem:[%s1561_s7 + $0x118] sm:$0xff]  ;;  %v828_v59 = vld [vmem:[%s1560_s6] sm:$0xff]  ;;  %v829_v60 = vld [vmem:[%s1560_s6 + $0x8] sm:$0xff] }
  0x22   :  { %143 = vperm.xlu1 %1195, %v65_v35   ;;  %v830_v61 = vld [vmem:[%s1560_s6 + $0x10] sm:$0xff]  ;;  %v831_v62 = vld [vmem:[%s1560_s6 + $0x18] sm:$0xff]  ;;  %v870_v63 = vld [vmem:[%s1561_s7 + $0x120] sm:$0x1] }
  0x23   :  { %v340_v0 = vld [vmem:[%s1557_s3] sm:$0xff] }
  0x24   :  { %1021 = vmatmul.mubr.msk.f32.gmra.mrb[12].mxu0 %vm146_vm0, %v47_v36  ;;  %1058 = vmatprep.mubr.f32.mxu1 %v340_v0  ;;  %v505_v0 = vld [vmem:[%s1558_s4] sm:$0xff] }
  0x25   :  { %358 = vperm.xlu0 %1194, %v348_v37   ;;  %1023 = vmatprep.mubr.msk.f32.mxu0 %vm146_vm0, %v48_v38 }
  0x26   :  { %363 = vperm.xlu1 %1195, %v349_v39  }
  0x28   :  { %1024 = vmatmul.mubr.msk.f32.gmra.mrb[14].mxu0 %vm146_vm0, %v49_v40 }
  0x29   :  { %378 = vperm.xlu0 %1194, %v352_v41   ;;  %1086 = vmatprep.mubr.msk.f32.mxu0 %vm561_vm1, %v505_v0 }
  0x2a   :  { %383 = vperm.xlu1 %1195, %v353_v42  }
  0x2d   :  { %368 = vperm.xlu0 %1194, %v350_v43  }
  0x2e   :  { %373 = vperm.xlu1 %1195, %v351_v44  }
  0x31   :  { %388 = vperm.xlu0 %1194, %v354_v45  }
  0x32   :  { %393 = vperm.xlu1 %1195, %v355_v46  }
  0x35   :  { %523 = vperm.xlu0 %1194, %v513_v47  }
  0x36   :  { %528 = vperm.xlu1 %1195, %v514_v48  }
  0x39   :  { %533 = vperm.xlu0 %1194, %v515_v49  }
  0x3a   :  { %538 = vperm.xlu1 %1195, %v516_v50  }
  0x3d   :  { %543 = vperm.xlu0 %1194, %v517_v51  }
  0x3e   :  { %548 = vperm.xlu1 %1195, %v518_v52  }
  0x41   :  { %553 = vperm.xlu0 %1194, %v519_v53  }
  0x42   :  { %558 = vperm.xlu1 %1195, %v520_v54  }
  0x45   :  { %709 = vperm.xlu0 %1194, %v703_v55  }
  0x46   :  { %714 = vperm.xlu1 %1195, %v704_v56  }
  0x49   :  { %719 = vperm.xlu0 %1194, %v705_v57   ;;  %v341_v57 = vld [vmem:[%s1557_s3 + $0x8] sm:$0xff] }
  0x4a   :  { %724 = vperm.xlu1 %1195, %v706_v58   ;;  %v342_v58 = vld [vmem:[%s1557_s3 + $0x10] sm:$0xff] }
  0x4d   :  { %834 = vperm.xlu0 %1194, %v828_v59   ;;  %v343_v59 = vld [vmem:[%s1557_s3 + $0x18] sm:$0xff] }
  0x4e   :  { %839 = vperm.xlu1 %1195, %v829_v60   ;;  %v344_v60 = vld [vmem:[%s1557_s3 + $0x20] sm:$0xff] }
  0x51   :  { %844 = vperm.xlu0 %1194, %v830_v61   ;;  %v345_v61 = vld [vmem:[%s1557_s3 + $0x28] sm:$0xff] }
  0x52   :  { %849 = vperm.xlu1 %1195, %v831_v62   ;;  %v346_v62 = vld [vmem:[%s1557_s3 + $0x30] sm:$0xff] }
  0x55   :  { %873 = vperm.xlu0 %1194, %v870_v63   ;;  %v347_v63 = vld [vmem:[%s1557_s3 + $0x38] sm:$0xff] }
  0x81   :  { %v79_v1 = vpop.permute.xlu1 %78 }
  0x84   :  { %v69_v2 = vpop.permute.xlu0 %68 }
  0x85   :  { %v84_v3 = vpop.permute.xlu1 %83 }
  0x88   :  { %v74_v4 = vpop.permute.xlu0 %73 }
  0x89   :  { %v94_v5 = vpop.permute.xlu1 %93 }
  0x8c   :  { %v89_v6 = vpop.permute.xlu0 %88 }
  0x8d   :  { %v104_v11 = vpop.permute.xlu1 %103 }
  0x90   :  { %v99_v14 = vpop.permute.xlu0 %98 }
  0x94   :  { %v109_v24 = vpop.permute.xlu0 %108 }
  0x95   :  { %v114_v22 = vpop.permute.xlu1 %113 }
  0x98   :  { %v119_v33 = vpop.permute.xlu0 %118 }
  0x99   :  { %v124_v30 = vpop.permute.xlu1 %123 }
  0x9c   :  { %v129_v43 = vpop.permute.xlu0 %128 }
  0x9d   :  { %v134_v41 = vpop.permute.xlu1 %133 }
  0xa0   :  { %v139_v52 = vpop.permute.xlu0 %138 }
  0xa1   :  { %v144_v49 = vpop.permute.xlu1 %143 }
  0xdf   :  { %v1004_v7 = vpop.f32.mrb[0].mxu0 }
  0xe0   :  { %v267_v8 = vadd.f32 %v1004_v7, %v74_v4  ;;  %v261_v9 = vpop.f32.mrb[1].mxu0 }
  0xe1   :  { %v262_v10 = vadd.f32 %v261_v9, %v69_v2  ;;  %v359_v2 = vpop.permute.xlu0 %358 }
  0xe3   :  { %v1007_v12 = vpop.f32.mrb[2].mxu0  ;;  %v1128_v13 = vpack.c.bf16 %v267_v8, %v262_v10 }
  0xe4   :  { %v277_v15 = vadd.f32 %v1007_v12, %v84_v3  ;;  %v271_v16 = vpop.f32.mrb[3].mxu0 }
  0xe5   :  { %v272_v17 = vadd.f32 %v271_v16, %v79_v1  ;;  %1129 = vmatprep.subr.bf16.mxu1 %v1128_v13  ;;  %v364_v1 = vpop.permute.xlu1 %363 }
  0xe6   :  { %1131 = vmatpush3.bf16.msra.mxu1 %v1128_v13 }
  0xe7   :  { %v1132_v18 = vpack.c.bf16 %v277_v15, %v272_v17  ;;  %v1010_v19 = vpop.f32.mrb[4].mxu0 }
  0xe8   :  { %v287_v20 = vadd.f32 %v1010_v19, %v94_v5  ;;  %v281_v21 = vpop.f32.mrb[5].mxu0  ;;  %v379_v5 = vpop.permute.xlu0 %378 }
  0xe9   :  { %v282_v23 = vadd.f32 %v281_v21, %v89_v6  ;;  %1133 = vmatprep.subr.bf16.mxu1 %v1132_v18  ;;  %v384_v3 = vpop.permute.xlu1 %383 }
  0xea   :  { %1135 = vmatpush3.bf16.msra.mxu1 %v1132_v18 }
  0xeb   :  { %v1136_v25 = vpack.c.bf16 %v287_v20, %v282_v23  ;;  %v1013_v26 = vpop.f32.mrb[6].mxu0 }
  0xec   :  { %v297_v27 = vadd.f32 %v1013_v26, %v104_v11  ;;  %v291_v28 = vpop.f32.mrb[7].mxu0  ;;  %v369_v10 = vpop.permute.xlu0 %368 }
  0xed   :  { %v292_v29 = vadd.f32 %v291_v28, %v99_v14  ;;  %1137 = vmatprep.subr.bf16.mxu1 %v1136_v25  ;;  %v374_v9 = vpop.permute.xlu1 %373 }
  0xee   :  { %1139 = vmatpush3.bf16.msra.mxu1 %v1136_v25 }
  0xef   :  { %v1140_v31 = vpack.c.bf16 %v297_v27, %v292_v29  ;;  %v1016_v32 = vpop.f32.mrb[8].mxu0 }
  0xf0   :  { %v307_v34 = vadd.f32 %v1016_v32, %v114_v22  ;;  %v301_v35 = vpop.f32.mrb[9].mxu0  ;;  %v389_v21 = vpop.permute.xlu0 %388  ;;  %v507_v32 = vld [vmem:[%s1558_s4 + $0x10] sm:$0xff] }
  0xf1   :  { %v302_v36 = vadd.f32 %v301_v35, %v109_v24  ;;  %1141 = vmatprep.subr.bf16.mxu1 %v1140_v31  ;;  %v394_v18 = vpop.permute.xlu1 %393  ;;  %v510_v35 = vld [vmem:[%s1558_s4 + $0x28] sm:$0xff] }
  0xf2   :  { %1143 = vmatpush3.bf16.msra.mxu1 %v1140_v31  ;;  %v506_v31 = vld [vmem:[%s1558_s4 + $0x8] sm:$0xff] }
  0xf3   :  { %v1144_v37 = vpack.c.bf16 %v307_v34, %v302_v36  ;;  %v1019_v38 = vpop.f32.mrb[10].mxu0  ;;  %v509_v34 = vld [vmem:[%s1558_s4 + $0x20] sm:$0xff]  ;;  %v511_v36 = vld [vmem:[%s1558_s4 + $0x30] sm:$0xff] }
  0xf4   :  { %v317_v39 = vadd.f32 %v1019_v38, %v124_v30  ;;  %v311_v40 = vpop.f32.mrb[11].mxu0  ;;  %v699_v38 = vld [vmem:[%s1559_s5] sm:$0xff] }
  0xf5   :  { %v312_v42 = vadd.f32 %v311_v40, %v119_v33  ;;  %1145 = vmatprep.subr.bf16.mxu1 %v1144_v37  ;;  %v508_v33 = vld [vmem:[%s1558_s4 + $0x18] sm:$0xff]  ;;  %v524_v40 = vpop.permute.xlu0 %523 }
  0xf6   :  { %1147 = vmatpush3.bf16.msra.mxu1 %v1144_v37  ;;  %v512_v37 = vld [vmem:[%s1558_s4 + $0x38] sm:$0xff] }
  0xf7   :  { %v1148_v44 = vpack.c.bf16 %v317_v39, %v312_v42  ;;  %v1022_v45 = vpop.f32.mrb[12].mxu0  ;;  %v529_v39 = vpop.permute.xlu1 %528 }
  0xf8   :  { %v327_v46 = vadd.f32 %v1022_v45, %v134_v41  ;;  %v321_v47 = vpop.f32.mrb[13].mxu0 }
  0xf9   :  { %v322_v48 = vadd.f32 %v321_v47, %v129_v43  ;;  %1149 = vmatprep.subr.bf16.mxu1 %v1148_v44  ;;  %v534_v43 = vpop.permute.xlu0 %533 }
  0xfa   :  { %1151 = vmatpush3.bf16.msra.mxu1 %v1148_v44 }
  0xfb   :  { %v1152_v50 = vpack.c.bf16 %v327_v46, %v322_v48  ;;  %v1025_v51 = vpop.f32.mrb[14].mxu0  ;;  %v539_v41 = vpop.permute.xlu1 %538 }
  0xfc   :  { %v337_v53 = vadd.f32 %v1025_v51, %v144_v49  ;;  %v331_v54 = vpop.f32.mrb[15].mxu0 }
  0xfd   :  { %v332_v55 = vadd.f32 %v331_v54, %v139_v52  ;;  %1153 = vmatprep.subr.bf16.mxu1 %v1152_v50 }
  0xfe   :  { %1155 = vmatpush3.bf16.msra.mxu1 %v1152_v50 }
  0xff   :  { %v1156_v56 = vpack.c.bf16 %v337_v53, %v332_v55  ;;  %v549_v52 = vpop.permute.xlu1 %548  ;;  %v544_v55 = vpop.permute.xlu0 %543 }
 0x101   :  { %1157 = vmatprep.subr.bf16.mxu1 %v1156_v56 }
 0x102   :  { %1159 = vmatpush3.bf16.msra.mxu1 %v1156_v56 }
 0x103   :  { %v559_v0 = vpop.permute.xlu1 %558 }
 0x105   :  { %1059 = vmatmul.mubr.f32.vlgmr.msra.gmra.mrb[0].mxu1 %v341_v57 }
 0x106   :  { %1061 = vmatprep.mubr.f32.mxu1 %v342_v58 }
 0x109   :  { %1062 = vmatmul.mubr.f32.gmra.mrb[2].mxu1 %v343_v59 }
 0x10a   :  { %1064 = vmatprep.mubr.f32.mxu1 %v344_v60 }
 0x10d   :  { %1065 = vmatmul.mubr.f32.gmra.mrb[4].mxu1 %v345_v61 }
 0x10e   :  { %1067 = vmatprep.mubr.f32.mxu1 %v346_v62 }
 0x111   :  { %1068 = vmatmul.mubr.f32.gmra.mrb[6].mxu1 %v347_v63 }
 0x112   :  { %1114 = vmatprep.mubr.msk.f32.mxu1 %vm561_vm1, %v699_v38 }
 0x1d8   :  { %v1060_v4 = vpop.f32.mrb[0].mxu1 }
 0x1d9   :  { %v462_v6 = vpop.f32.mrb[1].mxu1  ;;  %v468_v12 = vadd.f32 %v1060_v4, %v364_v1 }
 0x1da   :  { %v463_v15 = vadd.f32 %v462_v6, %v359_v2 }
 0x1dc   :  { %v1063_v7 = vpop.f32.mrb[2].mxu1 }
 0x1dd   :  { %v472_v8 = vpop.f32.mrb[3].mxu1  ;;  %v478_v22 = vadd.f32 %v1063_v7, %v374_v9 }
 0x1de   :  { %v473_v25 = vadd.f32 %v472_v8, %v369_v10 }
 0x1e0   :  { %v1066_v11 = vpop.f32.mrb[4].mxu1 }
 0x1e1   :  { %v488_v13 = vadd.f32 %v1066_v11, %v384_v3  ;;  %v482_v14 = vpop.f32.mrb[5].mxu1  ;;  %v554_v3 = vpop.permute.xlu0 %553  ;;  %v700_v11 = vld [vmem:[%s1559_s5 + $0x8] sm:$0xff] }
 0x1e2   :  { %v483_v16 = vadd.f32 %v482_v14, %v379_v5 }
 0x1e3   :  { %v502_v17 = vmul.f32 %v488_v13, %v468_v12  ;;  %v701_v12 = vld [vmem:[%s1559_s5 + $0x10] sm:$0xff]  ;;  %v702_v13 = vld [vmem:[%s1559_s5 + $0x18] sm:$0xff]  ;;  %s1221_s5 = smov [#allocation2]  }
 0x1e4   :  { %v501_v19 = vmul.f32 %v483_v16, %v463_v15  ;;  %v1069_v20 = vpop.f32.mrb[6].mxu1  ;;  %v715_v15 = vpop.permute.xlu1 %714  ;;  %s886_s14 = sshll.u32 %s1221_s5, 4  ;;  %s887_s14 = int_to_ptr.vmem [resolvable:$true] %s886_s14 }
 0x1e5   :  { %v498_v23 = vadd.f32 %v1069_v20, %v394_v18  ;;  %v492_v24 = vpop.f32.mrb[7].mxu1  ;;  %v710_v14 = vpop.permute.xlu0 %709  ;;  %s1196_s0 = scalar_lea.vmem %s887_s14, 16  ;;  %s1200_s15 = scalar_lea.vmem %s887_s14, 32 }
 0x1e6   :  { %v493_v26 = vadd.f32 %v492_v24, %v389_v21  ;;  %v1168_v27 = vpack.c.bf16 %v502_v17, %v501_v19  ;;  %p1197_p0 = scmp.ne.s32.totalorder %s887_s14, %s1196_s0  ;;  %p1201_p1 = scmp.lt.s32.totalorder %s887_s14, %s887_s14 }
 0x1e7   :  { %v504_v28 = vmul.f32 %v498_v23, %v478_v22  ;;  %p1202_p2 = scmp.lt.s32.totalorder %s1200_s15, %s1196_s0 }
 0x1e8   :  { %v503_v29 = vmul.f32 %v493_v26, %v473_v25  ;;  %1169 = vmatprep.subr.bf16.mxu0 %v1168_v27  ;;  %v725_v17 = vpop.permute.xlu1 %724 }
 0x1e9   :  { %1171 = vmatpush3.bf16.msra.mxu0 %v1168_v27  ;;  %v720_v16 = vpop.permute.xlu0 %719  ;;  %p1203_p3 = por %p1202_p2, %p1201_p1 }
 0x1ea   :  { %v1172_v30 = vpack.c.bf16 %v504_v28, %v503_v29 }
 0x1eb   :  { %p1204_p4 = pnand %p1203_p3, %p1197_p0 }
 0x1ec   :  { %1173 = vmatprep.subr.bf16.mxu0 %v1172_v30  ;;  %v840_v23 = vpop.permute.xlu1 %839 }
 0x1ed   :  { %1175 = vmatpush3.bf16.msra.mxu0 %v1172_v30  ;;  %v835_v22 = vpop.permute.xlu0 %834 }
 0x1f0   :  { %1087 = vmatmul.mubr.msk.f32.vlgmr.msra.gmra.mrb[16].mxu0 %vm561_vm1, %v506_v31 }
 0x1f1   :  { %1089 = vmatprep.mubr.msk.f32.mxu0 %vm561_vm1, %v507_v32 }
 0x1f4   :  { %1090 = vmatmul.mubr.msk.f32.gmra.mrb[18].mxu0 %vm561_vm1, %v508_v33 }
 0x1f5   :  { %1092 = vmatprep.mubr.msk.f32.mxu0 %vm561_vm1, %v509_v34 }
 0x1f8   :  { %1093 = vmatmul.mubr.msk.f32.gmra.mrb[20].mxu0 %vm561_vm1, %v510_v35 }
 0x1f9   :  { %1095 = vmatprep.mubr.msk.f32.mxu0 %vm561_vm1, %v511_v36  ;;  %v845_v36 = vpop.permute.xlu0 %844 }
 0x1fc   :  { %1096 = vmatmul.mubr.msk.f32.gmra.mrb[22].mxu0 %vm561_vm1, %v512_v37  ;;  %v850_v37 = vpop.permute.xlu1 %849 }
 0x2c3   :  { %v1088_v42 = vpop.f32.mrb[16].mxu0 }
 0x2c4   :  { %v658_v44 = vadd.f32 %v1088_v42, %v529_v39  ;;  %v652_v45 = vpop.f32.mrb[17].mxu0 }
 0x2c5   :  { %v653_v46 = vadd.f32 %v652_v45, %v524_v40 }
 0x2c6   :  { %v692_v47 = vmax.f32 %v658_v44, 0.0 }
 0x2c7   :  { %v691_v48 = vmax.f32 %v653_v46, 0.0  ;;  %v1091_v49 = vpop.f32.mrb[18].mxu0 }
 0x2c8   :  { %v668_v50 = vadd.f32 %v1091_v49, %v539_v41  ;;  %v662_v51 = vpop.f32.mrb[19].mxu0 }
 0x2c9   :  { %v1176_v53 = vpack.c.bf16 %v692_v47, %v691_v48  ;;  %v663_v54 = vadd.f32 %v662_v51, %v534_v43  ;;  %v874_v51 = vpop.permute.xlu0 %873 }
 0x2ca   :  { %v694_v56 = vmax.f32 %v668_v50, 0.0 }
 0x2cb   :  { %v693_v57 = vmax.f32 %v663_v54, 0.0  ;;  %v1094_v58 = vpop.f32.mrb[20].mxu0  ;;  %1177 = vmatprep.subr.bf16.mxu1 %v1176_v53 }
 0x2cc   :  { %v678_v59 = vadd.f32 %v1094_v58, %v549_v52  ;;  %v672_v60 = vpop.f32.mrb[21].mxu0  ;;  %1179 = vmatpush3.bf16.msra.mxu1 %v1176_v53 }
 0x2cd   :  { %v1180_v61 = vpack.c.bf16 %v694_v56, %v693_v57  ;;  %v673_v62 = vadd.f32 %v672_v60, %v544_v55 }
 0x2ce   :  { %v696_v63 = vmax.f32 %v678_v59, 0.0 }
 0x2cf   :  { %v695_v1 = vmax.f32 %v673_v62, 0.0  ;;  %v1097_v2 = vpop.f32.mrb[22].mxu0  ;;  %1181 = vmatprep.subr.bf16.mxu1 %v1180_v61 }
 0x2d0   :  { %v688_v4 = vadd.f32 %v1097_v2, %v559_v0  ;;  %v682_v5 = vpop.f32.mrb[23].mxu0  ;;  %1183 = vmatpush3.bf16.msra.mxu1 %v1180_v61 }
 0x2d1   :  { %v1184_v6 = vpack.c.bf16 %v696_v63, %v695_v1  ;;  %v683_v7 = vadd.f32 %v682_v5, %v554_v3 }
 0x2d2   :  { %v698_v8 = vmax.f32 %v688_v4, 0.0 }
 0x2d3   :  { %v697_v9 = vmax.f32 %v683_v7, 0.0  ;;  %1185 = vmatprep.subr.bf16.mxu1 %v1184_v6 }
 0x2d4   :  { %1187 = vmatpush3.bf16.msra.mxu1 %v1184_v6 }
 0x2d5   :  { %v1188_v10 = vpack.c.bf16 %v698_v8, %v697_v9 }
 0x2d7   :  { %1189 = vmatprep.subr.bf16.mxu1 %v1188_v10 }
 0x2d8   :  { %1191 = vmatpush3.bf16.msra.mxu1 %v1188_v10 }
 0x2db   :  { %1115 = vmatmul.mubr.msk.f32.vlgmr.msra.gmra.mrb[8].mxu1 %vm561_vm1, %v700_v11 }
 0x2dc   :  { %1117 = vmatprep.mubr.msk.f32.mxu1 %vm561_vm1, %v701_v12 }
 0x2df   :  { %1118 = vmatmul.mubr.msk.f32.gmra.mrb[10].mxu1 %vm561_vm1, %v702_v13 }
 0x3ae   :  { %v1116_v18 = vpop.f32.mrb[8].mxu1 }
 0x3af   :  { %v811_v19 = vadd.f32 %v1116_v18, %v715_v15  ;;  %v805_v20 = vpop.f32.mrb[9].mxu1 }
 0x3b0   :  { %v806_v21 = vadd.f32 %v805_v20, %v710_v14 }
 0x3b1   :  { %v825_v24 = vmax.f32 %v811_v19, 0.0 }
 0x3b2   :  { %v824_v25 = vmax.f32 %v806_v21, 0.0  ;;  %v1119_v26 = vpop.f32.mrb[10].mxu1 }
 0x3b3   :  { %v853_v27 = vmul.f32 %v840_v23, %v825_v24  ;;  %v821_v28 = vadd.f32 %v1119_v26, %v725_v17  ;;  %v815_v29 = vpop.f32.mrb[11].mxu1 }
 0x3b4   :  { %v852_v30 = vmul.f32 %v835_v22, %v824_v25  ;;  %v816_v31 = vadd.f32 %v815_v29, %v720_v16 }
 0x3b5   :  { %v858_v32 = vsel %vm856_vm2, %v853_v27, 0.0  ;;  %v827_v33 = vmax.f32 %v821_v28, 0.0 }
 0x3b6   :  { %v857_v34 = vsel %vm856_vm2, %v852_v30, 0.0  ;;  %v826_v35 = vmax.f32 %v816_v31, 0.0 }
 0x3b7   :  { %v859_v38 = vadd.f32 %v858_v32, %v857_v34  ;;  %v855_v39 = vmul.f32 %v850_v37, %v827_v33 }
 0x3b8   :  { %v854_v40 = vmul.f32 %v845_v36, %v826_v35 }
 0x3b9   :  { %v862_v43 = vsel %vm856_vm2, %v855_v39, 0.0 }
 0x3ba   :  { %v860_v41 = vsel %vm856_vm2, %v854_v40, 0.0 }
 0x3bb   :  { %v861_v42 = vadd.f32 %v860_v41, %v859_v38 }
 0x3bd   :  { %v863_v44 = vadd.f32 %v862_v43, %v861_v42 }
 0x3bf   :  { %v864_v45 = vrot.slane %v863_v44, 4 }
 0x3c1   :  { %v865_v46 = vadd.f32 %v864_v45, %v863_v44 }
 0x3c3   :  { %v866_v47 = vrot.slane %v865_v46, 2 }
 0x3c5   :  { %v867_v48 = vadd.f32 %v866_v47, %v865_v46 }
 0x3c7   :  { %v868_v49 = vrot.slane %v867_v48, 1 }
 0x3c9   :  { %v869_v50 = vadd.f32 %v868_v49, %v867_v48 }
 0x3cb   :  { %v876_v52 = vadd.f32 %v874_v51, %v869_v50 }
 0x3cd   :  { %v877_v53 = vmin.f32 %v876_v52, 0.0 }
 0x3cf   :  { %879 = vst.msk [vmem:[#allocation2] sm:$0x1] %vm878_vm3, %v877_v53 }
 0x3d0   :  { %1207 = shalt.err (!%p1204_p4)
}
 0x3d1   :  { %s1208_s17 = scalar_lea.hbm %s1562_s8, 16 }
 0x3d2   :  { %p1209_p5 = scmp.ne.s32.totalorder %s1562_s8, %s1208_s17  ;;  %p1212_p6 = scmp.lt.u32.totalorder %s1208_s17, %s1562_s8 }
 0x3d4   :  { %p1214_p7 = pnand %p1212_p6, %p1209_p5 }
 0x3d6   :  { %1217 = shalt.err (!%p1214_p7)
}
 0x3d7   :  { %889 = dma.vmem_to_hbm [thread:$0]  %s887_s14, 16, %s1562_s8, [#allocation3]  }
 0x3d8   :  { %1218 = dma.done.wait [#allocation3], 16  }
 0x3d9   :  { %1219 = vsyncadd [#allocation3], 4294967280 }
 0x3da   :  { %893 = vsyncpa [#allocation3], 1 }

</bundles_post_ra>
